<compile_context>
chip_gen: v7x
topology: tpu7x:2x2x1
jax: 0.10.0
libtpu: 0.0.40
codegen_flags: <defaults>
</compile_context>

<pallas_src>
import numpy as np
import jax
import jax.numpy as jnp
from jax.experimental import pallas as pl
from jax.experimental.pallas import tpu as pltpu


def _round_up(v, m):
    return ((v + m - 1) // m) * m


# ----------------------------------------------------------------------------
# Fused forward kernel.
# ----------------------------------------------------------------------------
def _critic_kernel(x_ref, w1_ref, b1_ref, w2_ref, b2_ref, wf_ref, bf_ref,
                   wl_ref, bl_ref, o_ref):
    f32 = jnp.float32
    bf16 = jnp.bfloat16
    # conv1 (dense-folded) + ReLU: bf16 MXU operands, f32 accumulation,
    # bias/ReLU in f32 (v5e VPU has no bf16).
    h = jnp.dot(x_ref[...].astype(bf16), w1_ref[...], preferred_element_type=f32)
    h = jnp.maximum(h + b1_ref[...], 0.0)
    # conv2 (dense-folded, NCHW flatten folded into the matrix) + ReLU.
    h = jnp.dot(h.astype(bf16), w2_ref[...], preferred_element_type=f32)
    h = jnp.maximum(h + b2_ref[...], 0.0)
    # encoder FC -> latent (zero-padded to 128 lanes); Critic applies ReLU to
    # the (detached) latent.
    z = jnp.dot(h.astype(bf16), wf_ref[...], preferred_element_type=f32)
    z = jnp.maximum(z + bf_ref[...], 0.0)
    # latent -> 1 head as a VPU/XLU reduction (wl stored as a (1, lat_pad) f32
    # row; padded columns are zero so they contribute nothing).
    o_ref[...] = jnp.sum(z * wl_ref[...], axis=-1, keepdims=True) + bl_ref[...]


def critic_forward(params, x):
    """x: [N, H, W] float32 -> [N, 1] float32."""
    n = x.shape[0]
    xf = x.reshape(n, -1)                      # free reshape (merges trailing dims)
    k0 = xf.shape[1]
    h1 = params["w1d"].shape[1]
    h2 = params["w2d"].shape[1]
    lat = params["fc_w"].shape[1]              # already padded to a multiple of 128

    # Batch tiling:
    #  - n <= 128: single block (tiny batches are launch-overhead bound anyway).
    #  - n  > 128: tiles up to 512 rows to amortize the ~0.35 us/step pipeline
    #    cost, but ALWAYS >= 2 tiles so v7x's two TensorCores both get work
    #    (dimension_semantics=("parallel",) shards the grid axis across TCs).
    if n <= 128:
        tm = n
    else:
        tm = min(512, _round_up(pl.cdiv(n, 2), 8))
    grid = (pl.cdiv(n, tm),)

    const = lambda i: (0, 0)                   # weights/biases: same block every step
    single = pl.Buffered(1)                    # grid-invariant -> no double buffer

    cost = pl.CostEstimate(
        flops=2 * n * (k0 * h1 + h1 * h2 + h2 * lat + lat),
        transcendentals=0,
        bytes_accessed=(4 * (n * k0 + n)                       # x in, out (f32)
                        + 2 * (k0 * h1 + h1 * h2 + h2 * lat)   # bf16 weights
                        + 4 * (h1 + h2 + 2 * lat + 1)),        # f32 biases + head
    )
    return pl.pallas_call(
        _critic_kernel,
        out_shape=jax.ShapeDtypeStruct((n, 1), jnp.float32),
        grid=grid,
        in_specs=[
            pl.BlockSpec((tm, k0), lambda i: (i, 0)),
            pl.BlockSpec((k0, h1), const, pipeline_mode=single),
            pl.BlockSpec((1, h1), const, pipeline_mode=single),
            pl.BlockSpec((h1, h2), const, pipeline_mode=single),
            pl.BlockSpec((1, h2), const, pipeline_mode=single),
            pl.BlockSpec((h2, lat), const, pipeline_mode=single),
            pl.BlockSpec((1, lat), const, pipeline_mode=single),
            pl.BlockSpec((1, lat), const, pipeline_mode=single),
            pl.BlockSpec((1, 1), const, pipeline_mode=single),
        ],
        out_specs=pl.BlockSpec((tm, 1), lambda i: (i, 0)),
        compiler_params=pltpu.CompilerParams(dimension_semantics=("parallel",)),
        cost_estimate=cost,
    )(xf, params["w1d"], params["b1d"], params["w2d"], params["b2d"],
      params["fc_w"], params["fc_b"], params["lin_w_row"], params["lin_b"])


# ----------------------------------------------------------------------------
# Parameters.  Conv weights stored [kh, kw, Cin, Cout]; linears as [In, Out].
# ----------------------------------------------------------------------------
def init_params(key, latent_size, in_hw):
    h, w = in_hw
    flat = 16 * (h // 4) * (w // 4)
    ks = jax.random.split(key, 8)

    def u(k, shape, fan_in):
        bound = 1.0 / np.sqrt(fan_in)
        return jax.random.uniform(k, shape, jnp.float32, -bound, bound)

    return {
        "conv1_w": u(ks[0], (3, 3, 1, 8), 1 * 9),
        "conv1_b": u(ks[1], (8,), 1 * 9),
        "conv2_w": u(ks[2], (3, 3, 8, 16), 8 * 9),
        "conv2_b": u(ks[3], (16,), 8 * 9),
        "fc_w":    u(ks[4], (flat, latent_size), flat),
        "fc_b":    u(ks[5], (1, latent_size), flat),
        "lin_w":   u(ks[6], (latent_size, 1), latent_size),
        "lin_b":   u(ks[7], (1, 1), latent_size),
    }


def _conv_to_dense(w, b, in_hw, cin, stride, pad, out_order):
    """Exact dense [H*W*Cin, Ho*Wo*Cout] lowering of a 2D conv (one-time, at init).

    Rows follow an NHWC flatten of the input; columns follow either an NHWC or
    an NCHW flatten of the output (the latter folds PyTorch's view(N,-1)-on-NCHW
    directly into the matrix).
    """
    w = np.asarray(w, np.float32)
    b = np.asarray(b, np.float32)
    kh, kw, _, cout = w.shape
    H, W = in_hw
    Ho = (H + 2 * pad - kh) // stride + 1
    Wo = (W + 2 * pad - kw) // stride + 1
    m = np.zeros((H * W * cin, Ho * Wo * cout), np.float32)
    co_idx = np.arange(cout)
    for ho in range(Ho):
        for wo in range(Wo):
            if out_order == "nhwc":
                cols = (ho * Wo + wo) * cout + co_idx
            else:  # "nchw"
                cols = co_idx * (Ho * Wo) + ho * Wo + wo
            for dh in range(kh):
                hi = ho * stride + dh - pad
                if not 0 <= hi < H:
                    continue
                for dw in range(kw):
                    wi = wo * stride + dw - pad
                    if not 0 <= wi < W:
                        continue
                    for ci in range(cin):
                        m[(hi * W + wi) * cin + ci, cols] += w[dh, dw, ci, :]
    bias = np.tile(b, Ho * Wo) if out_order == "nhwc" else np.repeat(b, Ho * Wo)
    return jnp.asarray(m), jnp.asarray(bias[None, :])


def prepare_params(raw, in_hw):
    """Fold conv structure + NCHW flatten into dense matrices; cast matmul
    weights to bf16; zero-pad the latent dim to a full 128-lane group."""
    h, w = in_hw
    w1d, b1d = _conv_to_dense(raw["conv1_w"], raw["conv1_b"], (h, w), 1,
                              stride=2, pad=1, out_order="nhwc")
    w2d, b2d = _conv_to_dense(raw["conv2_w"], raw["conv2_b"], (h // 2, w // 2), 8,
                              stride=2, pad=1, out_order="nchw")
    lat = raw["fc_w"].shape[1]
    lat_pad = _round_up(max(lat, 128), 128)
    pad = lat_pad - lat
    fc_w = jnp.pad(raw["fc_w"], ((0, 0), (0, pad)))
    fc_b = jnp.pad(raw["fc_b"], ((0, 0), (0, pad)))
    wl_row = jnp.pad(raw["lin_w"].T, ((0, 0), (0, pad)))   # (1, lat_pad) row

    bf16 = jnp.bfloat16
    return {
        "w1d": w1d.astype(bf16), "b1d": b1d,
        "w2d": w2d.astype(bf16), "b2d": b2d,
        "fc_w": fc_w.astype(bf16), "fc_b": fc_b,
        "lin_w_row": wl_row,            # stays f32 (VPU reduction path)
        "lin_b": raw["lin_b"],
    }


# ----------------------------------------------------------------------------
# Pure-JAX reference (lax.conv), used only to validate the fused kernel.
# ----------------------------------------------------------------------------
def _conv_nhwc(x, w, b, stride, pad):
    out = jax.lax.conv_general_dilated(
        x, w, window_strides=(stride, stride),
        padding=[(pad, pad), (pad, pad)],
        dimension_numbers=("NHWC", "HWIO", "NHWC"),
        precision=jax.lax.Precision.HIGHEST)
    return out + b


def critic_reference(raw, x):
    n = x.shape[0]
    hi = jax.lax.Precision.HIGHEST
    h = x[..., None]                                         # unsqueeze -> NHWC, C=1
    h = jax.nn.relu(_conv_nhwc(h, raw["conv1_w"], raw["conv1_b"], 2, 1))
    h = jax.nn.relu(_conv_nhwc(h, raw["conv2_w"], raw["conv2_b"], 2, 1))
    h = h.transpose(0, 3, 1, 2).reshape(n, -1)               # NCHW flatten
    z = jnp.dot(h, raw["fc_w"], precision=hi) + raw["fc_b"]  # encoder FC (detach = no-op)
    return jnp.dot(jax.nn.relu(z), raw["lin_w"], precision=hi) + raw["lin_b"]


if __name__ == "__main__":
    key = jax.random.PRNGKey(0)
    pkey, xkey, xkey2 = jax.random.split(key, 3)

    batch, height, width, latent = 2, 16, 16, 32
    raw = init_params(pkey, latent, (height, width))
    params = prepare_params(raw, (height, width))

    fwd = jax.jit(critic_forward)

    # Small batch (single grid step).
    x = jax.random.normal(xkey, (batch, height, width), jnp.float32)
    out = fwd(params, x)
    jax.block_until_ready(out)
    assert out.shape == (batch, 1) and out.dtype == jnp.float32
    ref = critic_reference(raw, x)
    # Tolerance loosened for bf16 MXU operands (f32 accumulation).
    np.testing.assert_allclose(np.asarray(out), np.asarray(ref), rtol=5e-2, atol=5e-2)

    # Rollout-sized batch exercising the tiled, "parallel" grid path (2 tiles
    # of 128 rows -> both TensorCores on v7x).
    big = 256
    xb = jax.random.normal(xkey2, (big, height, width), jnp.float32)
    outb = fwd(params, xb)
    jax.block_until_ready(outb)
    assert outb.shape == (big, 1) and outb.dtype == jnp.float32
    refb = critic_reference(raw, xb)
    np.testing.assert_allclose(np.asarray(outb), np.asarray(refb), rtol=5e-2, atol=5e-2)

    print("KERNEL_OK")
</pallas_src>

<mosaic_0001>
module attributes {stable_mosaic.version = 11 : i64} {
  func.func @_critic_kernel(%arg0: i32, %arg1: memref<2x256xf32, #tpu.memory_space<vmem>>, %arg2: memref<256x512xbf16, #tpu.memory_space<vmem>>, %arg3: memref<1x512xf32, #tpu.memory_space<vmem>>, %arg4: memref<512x256xbf16, #tpu.memory_space<vmem>>, %arg5: memref<1x256xf32, #tpu.memory_space<vmem>>, %arg6: memref<256x128xbf16, #tpu.memory_space<vmem>>, %arg7: memref<1x128xf32, #tpu.memory_space<vmem>>, %arg8: memref<1x128xf32, #tpu.memory_space<vmem>>, %arg9: memref<1x1xf32, #tpu.memory_space<vmem>>, %arg10: memref<2x1xf32, #tpu.memory_space<vmem>>) attributes {dimension_semantics = [#tpu.dimension_semantics<parallel>], iteration_bounds = array<i64: 1>, scalar_prefetch = 0 : i64, scratch_operands = 0 : i64, tpu.core_type = #tpu.core_type<tc>, window_params = [{transform_indices = @transform_0, window_bounds = array<i64: 2, 256>}, {pipeline_mode = #tpu.pipeline_mode<synchronous>, transform_indices = @transform_1, window_bounds = array<i64: 256, 512>}, {pipeline_mode = #tpu.pipeline_mode<synchronous>, transform_indices = @transform_2, window_bounds = array<i64: 1, 512>}, {pipeline_mode = #tpu.pipeline_mode<synchronous>, transform_indices = @transform_3, window_bounds = array<i64: 512, 256>}, {pipeline_mode = #tpu.pipeline_mode<synchronous>, transform_indices = @transform_4, window_bounds = array<i64: 1, 256>}, {pipeline_mode = #tpu.pipeline_mode<synchronous>, transform_indices = @transform_5, window_bounds = array<i64: 256, 128>}, {pipeline_mode = #tpu.pipeline_mode<synchronous>, transform_indices = @transform_6, window_bounds = array<i64: 1, 128>}, {pipeline_mode = #tpu.pipeline_mode<synchronous>, transform_indices = @transform_7, window_bounds = array<i64: 1, 128>}, {pipeline_mode = #tpu.pipeline_mode<synchronous>, transform_indices = @transform_8, window_bounds = array<i64: 1, 1>}, {transform_indices = @transform_9, window_bounds = array<i64: 2, 1>}]} {
    %c0 = arith.constant 0 : index
    %c0_0 = arith.constant 0 : index
    %0 = vector.load %arg1[%c0, %c0_0] : memref<2x256xf32, #tpu.memory_space<vmem>>, vector<2x256xf32>
    %1 = arith.truncf %0 : vector<2x256xf32> to vector<2x256xbf16>
    %c0_1 = arith.constant 0 : index
    %c0_2 = arith.constant 0 : index
    %2 = vector.load %arg2[%c0_1, %c0_2] : memref<256x512xbf16, #tpu.memory_space<vmem>>, vector<256x512xbf16>
    %cst = arith.constant dense<0.000000e+00> : vector<2x512xf32>
    %3 = tpu.matmul %1, %2, %cst {dimension_numbers = #tpu.dot_dimension_numbers<[1], [0], [0], [1], [0, 0, 1, 1], [], []>} : vector<2x256xbf16>, vector<256x512xbf16>, vector<2x512xf32> -> vector<2x512xf32>
    %c0_3 = arith.constant 0 : index
    %c0_4 = arith.constant 0 : index
    %4 = vector.load %arg3[%c0_3, %c0_4] : memref<1x512xf32, #tpu.memory_space<vmem>>, vector<1x512xf32>
    %5 = vector.broadcast %4 : vector<1x512xf32> to vector<2x512xf32>
    %6 = arith.addf %3, %5 : vector<2x512xf32>
    %cst_5 = arith.constant 0.000000e+00 : f32
    %7 = vector.broadcast %cst_5 : f32 to vector<2x512xf32>
    %8 = arith.maximumf %6, %7 : vector<2x512xf32>
    %9 = arith.truncf %8 : vector<2x512xf32> to vector<2x512xbf16>
    %c0_6 = arith.constant 0 : index
    %c0_7 = arith.constant 0 : index
    %10 = vector.load %arg4[%c0_6, %c0_7] : memref<512x256xbf16, #tpu.memory_space<vmem>>, vector<512x256xbf16>
    %cst_8 = arith.constant dense<0.000000e+00> : vector<2x256xf32>
    %11 = tpu.matmul %9, %10, %cst_8 {dimension_numbers = #tpu.dot_dimension_numbers<[1], [0], [0], [1], [0, 0, 1, 1], [], []>} : vector<2x512xbf16>, vector<512x256xbf16>, vector<2x256xf32> -> vector<2x256xf32>
    %c0_9 = arith.constant 0 : index
    %c0_10 = arith.constant 0 : index
    %12 = vector.load %arg5[%c0_9, %c0_10] : memref<1x256xf32, #tpu.memory_space<vmem>>, vector<1x256xf32>
    %13 = vector.broadcast %12 : vector<1x256xf32> to vector<2x256xf32>
    %14 = arith.addf %11, %13 : vector<2x256xf32>
    %cst_11 = arith.constant 0.000000e+00 : f32
    %15 = vector.broadcast %cst_11 : f32 to vector<2x256xf32>
    %16 = arith.maximumf %14, %15 : vector<2x256xf32>
    %17 = arith.truncf %16 : vector<2x256xf32> to vector<2x256xbf16>
    %c0_12 = arith.constant 0 : index
    %c0_13 = arith.constant 0 : index
    %18 = vector.load %arg6[%c0_12, %c0_13] : memref<256x128xbf16, #tpu.memory_space<vmem>>, vector<256x128xbf16>
    %cst_14 = arith.constant dense<0.000000e+00> : vector<2x128xf32>
    %19 = tpu.matmul %17, %18, %cst_14 {dimension_numbers = #tpu.dot_dimension_numbers<[1], [0], [0], [1], [0, 0, 1, 1], [], []>} : vector<2x256xbf16>, vector<256x128xbf16>, vector<2x128xf32> -> vector<2x128xf32>
    %c0_15 = arith.constant 0 : index
    %c0_16 = arith.constant 0 : index
    %20 = vector.load %arg7[%c0_15, %c0_16] : memref<1x128xf32, #tpu.memory_space<vmem>>, vector<1x128xf32>
    %21 = vector.broadcast %20 : vector<1x128xf32> to vector<2x128xf32>
    %22 = arith.addf %19, %21 : vector<2x128xf32>
    %cst_17 = arith.constant 0.000000e+00 : f32
    %23 = vector.broadcast %cst_17 : f32 to vector<2x128xf32>
    %24 = arith.maximumf %22, %23 : vector<2x128xf32>
    %c0_18 = arith.constant 0 : index
    %c0_19 = arith.constant 0 : index
    %25 = vector.load %arg8[%c0_18, %c0_19] : memref<1x128xf32, #tpu.memory_space<vmem>>, vector<1x128xf32>
    %26 = vector.broadcast %25 : vector<1x128xf32> to vector<2x128xf32>
    %27 = arith.mulf %24, %26 : vector<2x128xf32>
    %cst_20 = arith.constant dense<0.000000e+00> : vector<2xf32>
    %28 = vector.multi_reduction <add>, %27, %cst_20 [1] : vector<2x128xf32> to vector<2xf32>
    %29 = vector.shape_cast %28 : vector<2xf32> to vector<2x1xf32>
    %c0_21 = arith.constant 0 : index
    %c0_22 = arith.constant 0 : index
    %30 = vector.load %arg9[%c0_21, %c0_22] : memref<1x1xf32, #tpu.memory_space<vmem>>, vector<1x1xf32>
    %31 = vector.broadcast %30 : vector<1x1xf32> to vector<2x1xf32>
    %32 = arith.addf %29, %31 : vector<2x1xf32>
    %c0_23 = arith.constant 0 : index
    %c0_24 = arith.constant 0 : index
    %33 = vector.load %arg10[%c0_23, %c0_24] : memref<2x1xf32, #tpu.memory_space<vmem>>, vector<2x1xf32>
    tpu.vector_store %arg10[%c0_23, %c0_24], %32 {strides = array<i32>} : memref<2x1xf32, #tpu.memory_space<vmem>>, vector<2x1xf32>,
    return
  }
  func.func @transform_0(%arg0: i32) -> (i32, i32) {
    %c0_i32 = arith.constant 0 : i32
    %c0_i32_0 = arith.constant 0 : i32
    return %arg0, %c0_i32 : i32, i32
  }
  func.func @transform_1(%arg0: i32) -> (i32, i32) {
    %c0_i32 = arith.constant 0 : i32
    %c0_i32_0 = arith.constant 0 : i32
    %c0_i32_1 = arith.constant 0 : i32
    return %c0_i32, %c0_i32_0 : i32, i32
  }
  func.func @transform_2(%arg0: i32) -> (i32, i32) {
    %c0_i32 = arith.constant 0 : i32
    %c0_i32_0 = arith.constant 0 : i32
    %c0_i32_1 = arith.constant 0 : i32
    return %c0_i32, %c0_i32_0 : i32, i32
  }
  func.func @transform_3(%arg0: i32) -> (i32, i32) {
    %c0_i32 = arith.constant 0 : i32
    %c0_i32_0 = arith.constant 0 : i32
    %c0_i32_1 = arith.constant 0 : i32
    return %c0_i32, %c0_i32_0 : i32, i32
  }
  func.func @transform_4(%arg0: i32) -> (i32, i32) {
    %c0_i32 = arith.constant 0 : i32
    %c0_i32_0 = arith.constant 0 : i32
    %c0_i32_1 = arith.constant 0 : i32
    return %c0_i32, %c0_i32_0 : i32, i32
  }
  func.func @transform_5(%arg0: i32) -> (i32, i32) {
    %c0_i32 = arith.constant 0 : i32
    %c0_i32_0 = arith.constant 0 : i32
    %c0_i32_1 = arith.constant 0 : i32
    return %c0_i32, %c0_i32_0 : i32, i32
  }
  func.func @transform_6(%arg0: i32) -> (i32, i32) {
    %c0_i32 = arith.constant 0 : i32
    %c0_i32_0 = arith.constant 0 : i32
    %c0_i32_1 = arith.constant 0 : i32
    return %c0_i32, %c0_i32_0 : i32, i32
  }
  func.func @transform_7(%arg0: i32) -> (i32, i32) {
    %c0_i32 = arith.constant 0 : i32
    %c0_i32_0 = arith.constant 0 : i32
    %c0_i32_1 = arith.constant 0 : i32
    return %c0_i32, %c0_i32_0 : i32, i32
  }
  func.func @transform_8(%arg0: i32) -> (i32, i32) {
    %c0_i32 = arith.constant 0 : i32
    %c0_i32_0 = arith.constant 0 : i32
    %c0_i32_1 = arith.constant 0 : i32
    return %c0_i32, %c0_i32_0 : i32, i32
  }
  func.func @transform_9(%arg0: i32) -> (i32, i32) {
    %c0_i32 = arith.constant 0 : i32
    %c0_i32_0 = arith.constant 0 : i32
    return %arg0, %c0_i32 : i32, i32
  }
}

</mosaic_0001>

<bundles_post_ra>
// kernel: critic_forward.1
= control target key start
LH: loop header
LB: loop body
LE: loop exit
PB: predicated region body
PF: predicated region fallthrough
CT: control target
= control target key end

     0   :  { %s1885_s0 = inlined_call_operand.vmem [shape: f32[2,256], index: 0, kind: input, shape index: {}]   ;;  %s1886_s1 = inlined_call_operand.hbm [shape: bf16[256,512], index: 1, kind: input, shape index: {}]   ;;  %s1887_s2 = inlined_call_operand.vmem [shape: f32[1,512], index: 2, kind: input, shape index: {}]   ;;  %s1888_s3 = inlined_call_operand.hbm [shape: bf16[512,256], index: 3, kind: input, shape index: {}]   ;;  %s1889_s4 = inlined_call_operand.vmem [shape: f32[1,256], index: 4, kind: input, shape index: {}]   ;;  %s1890_s5 = inlined_call_operand.hbm [shape: bf16[256,128], index: 5, kind: input, shape index: {}]   ;;  %s1891_s6 = inlined_call_operand.vmem [shape: f32[1,128], index: 6, kind: input, shape index: {}]   ;;  %s1892_s7 = inlined_call_operand.vmem [shape: f32[1,128], index: 7, kind: input, shape index: {}]   ;;  %s1893_s8 = inlined_call_operand.<no memory space> [shape: f32[1,1], index: 8, kind: input, shape index: {}]   ;;  %s1894_s9 = inlined_call_operand.vmem [shape: f32[2,1], index: 9, kind: output, shape index: {}]  }
   0x1   :  { %v14_v0 = vstv %s1893_s8 }
   0x2   :  { %15 = vst [vmem:[#allocation2] sm:$0x1] %v14_v0 }
   0x3   :  { %16 = vsyncpa [#allocation4], 0 }
   0x4   :  { %17 = vsyncpa [#allocation6], 0  ;;  %s1735_s11 = smov [#allocation5]   ;;  %s1665_s15 = scalar_lea.hbm %s1888_s3, 8192 }
   0x5   :  { %s39_s12 = sshll.u32 %s1735_s11, 4  ;;  %p1666_p0 = scmp.ne.s32.totalorder %s1888_s3, %s1665_s15  ;;  %s40_s12 = int_to_ptr.vmem [resolvable:$true] %s39_s12 }
   0x6   :  { %p1669_p1 = scmp.lt.u32.totalorder %s1665_s15, %s1888_s3 }
   0x8   :  { %p1671_p2 = pnand %p1669_p1, %p1666_p0 }
   0xa   :  { %1674 = shalt.err (!%p1671_p2)
}
   0xb   :  { %s1675_s8 = scalar_lea.vmem %s40_s12, 8192  ;;  %p1680_p4 = scmp.lt.s32.totalorder %s40_s12, %s40_s12 }
   0xc   :  { %p1676_p3 = scmp.ne.s32.totalorder %s40_s12, %s1675_s8  ;;  %p1681_p5 = scmp.lt.s32.totalorder %s1675_s8, %s1675_s8 }
   0xe   :  { %p1682_p6 = por %p1681_p5, %p1680_p4 }
  0x10   :  { %p1683_p7 = pnand %p1682_p6, %p1676_p3 }
  0x12   :  { %1686 = shalt.err (!%p1683_p7)
}
  0x13   :  { %s1736_s20 = smov 128   ;;  %s1737_s21 = smov 8  }
  0x14   :  { %45 = dma.hbm_to_vmem [thread:$0]  %s1888_s3, 8192, %s40_s12, [#allocation6], %s1736_s20, %s1736_s20, %s1737_s21  }
  0x15   :  { %s1738_s24 = smov [#allocation3]   ;;  %s1687_s28 = scalar_lea.hbm %s1886_s1, 8192 }
  0x16   :  { %s25_s25 = sshll.u32 %s1738_s24, 4  ;;  %p1688_p8 = scmp.ne.s32.totalorder %s1886_s1, %s1687_s28  ;;  %s26_s25 = int_to_ptr.vmem [resolvable:$true] %s25_s25 }
  0x17   :  { %p1691_p9 = scmp.lt.u32.totalorder %s1687_s28, %s1886_s1 }
  0x19   :  { %p1693_p10 = pnand %p1691_p9, %p1688_p8 }
  0x1b   :  { %1696 = shalt.err (!%p1693_p10)
}
  0x1c   :  { %s1697_s13 = scalar_lea.vmem %s26_s25, 8192  ;;  %p1702_p12 = scmp.lt.s32.totalorder %s26_s25, %s26_s25 }
  0x1d   :  { %p1698_p11 = scmp.ne.s32.totalorder %s26_s25, %s1697_s13  ;;  %p1703_p13 = scmp.lt.s32.totalorder %s1697_s13, %s1697_s13 }
  0x1f   :  { %p1704_p0 = por %p1703_p13, %p1702_p12 }
  0x21   :  { %p1705_p1 = pnand %p1704_p0, %p1698_p11 }
  0x23   :  { %1708 = shalt.err (!%p1705_p1)
}
  0x24   :  { %s1739_s3 = smov 256   ;;  %s1740_s12 = smov 16  }
  0x25   :  { %31 = dma.hbm_to_vmem [thread:$0]  %s1886_s1, 8192, %s26_s25, [#allocation4], %s1739_s3, %s1739_s3, %s1740_s12  }
  0x26   :  { %s1741_s16 = smov [#allocation7]   ;;  %s1709_s8 = scalar_lea.hbm %s1890_s5, 2048 }
  0x27   :  { %s53_s17 = sshll.u32 %s1741_s16, 4  ;;  %p1710_p2 = scmp.ne.s32.totalorder %s1890_s5, %s1709_s8  ;;  %s54_s17 = int_to_ptr.vmem [resolvable:$true] %s53_s17 }
  0x28   :  { %p1713_p3 = scmp.lt.u32.totalorder %s1709_s8, %s1890_s5 }
  0x2a   :  { %p1715_p4 = pnand %p1713_p3, %p1710_p2 }
  0x2c   :  { %1718 = shalt.err (!%p1715_p4)
}
  0x2d   :  { %s1719_s24 = scalar_lea.vmem %s54_s17, 2048  ;;  %p1724_p6 = scmp.lt.s32.totalorder %s54_s17, %s54_s17 }
  0x2e   :  { %p1720_p5 = scmp.ne.s32.totalorder %s54_s17, %s1719_s24  ;;  %p1725_p7 = scmp.lt.s32.totalorder %s1719_s24, %s1719_s24 }
  0x30   :  { %p1726_p8 = por %p1725_p7, %p1724_p6 }
  0x32   :  { %p1727_p9 = pnand %p1726_p8, %p1720_p5 }
  0x34   :  { %1730 = shalt.err (!%p1727_p9)
}
  0x35   :  { %s1742_s1 = smov 64   ;;  %s1743_s25 = smov 4  }
  0x36   :  { %59 = dma.hbm_to_vmem [thread:$0]  %s1890_s5, 2048, %s54_s17, [#allocation6], %s1742_s1, %s1742_s1, %s1743_s25  }
  0x37   :  { %1731 = dma.done.wait [#allocation4], 8192  }
  0x38   :  { %1732 = vsyncadd [#allocation4], 4294959104 }
  0x39   :  { %1733 = dma.done.wait [#allocation6], 10240  }
  0x3a   :  { %1734 = vsyncadd [#allocation6], 4294957056  ;;  %v1457_v1 = vld [vmem:[#allocation3 + $0x4] ss:$16 sps:$4 sm:$0xff]   ;;  %v1459_v2 = vld [vmem:[#allocation3] ss:$16 sps:$4 sm:$0xff]  }
  0x3b   :  { %496 = vmatprep.subr.bf16.mxu1 %v1457_v1  ;;  %v1460_v3 = vld [vmem:[#allocation3 + $0x24] ss:$16 sps:$4 sm:$0xff]   ;;  %v1462_v4 = vld [vmem:[#allocation3 + $0x20] ss:$16 sps:$4 sm:$0xff]   ;;  %v1507_v46 = vld [vmem:[#allocation3 + $0xc] ss:$16 sps:$4 sm:$0xff]  }
  0x3c   :  { %497 = vmatpush1.bf16.msra.mxu1 %v1459_v2  ;;  %v1463_v5 = vld [vmem:[#allocation3 + $0x44] ss:$16 sps:$4 sm:$0xff]   ;;  %v1465_v6 = vld [vmem:[#allocation3 + $0x40] ss:$16 sps:$4 sm:$0xff]   ;;  %v1505_v48 = vld [vmem:[#allocation3 + $0x8] ss:$16 sps:$4 sm:$0xff]  }
  0x3d   :  { %498 = vmatprep.subr.bf16.mxu1 %v1460_v3  ;;  %v1466_v7 = vld [vmem:[#allocation3 + $0x64] ss:$16 sps:$4 sm:$0xff]   ;;  %v1468_v8 = vld [vmem:[#allocation3 + $0x60] ss:$16 sps:$4 sm:$0xff]   ;;  %v1510_v50 = vld [vmem:[#allocation3 + $0x2c] ss:$16 sps:$4 sm:$0xff]  }
  0x3e   :  { %v1469_v9 = vld [vmem:[#allocation3 + $0x84] ss:$16 sps:$4 sm:$0xff]   ;;  %v1471_v10 = vld [vmem:[#allocation3 + $0x80] ss:$16 sps:$4 sm:$0xff]   ;;  %v1508_v53 = vld [vmem:[#allocation3 + $0x28] ss:$16 sps:$4 sm:$0xff]  }
  0x3f   :  { %v1472_v11 = vld [vmem:[#allocation3 + $0xa4] ss:$16 sps:$4 sm:$0xff]   ;;  %v1474_v12 = vld [vmem:[#allocation3 + $0xa0] ss:$16 sps:$4 sm:$0xff]   ;;  %v1513_v54 = vld [vmem:[#allocation3 + $0x4c] ss:$16 sps:$4 sm:$0xff]  }
  0x40   :  { %499 = vmatpush1.bf16.msra.mxu1 %v1462_v4  ;;  %v1475_v13 = vld [vmem:[#allocation3 + $0xc4] ss:$16 sps:$4 sm:$0xff]   ;;  %v1836_v14 = vld.sshfl [vmem:[%s1885_s0] sm:$0x33 pattern:$0x76325410] }
  0x41   :  { %500 = vmatprep.subr.bf16.mxu1 %v1463_v5  ;;  %v85_v15 = vcombine.high %v1836_v14, %v1836_v14  ;;  %v1477_v16 = vld [vmem:[#allocation3 + $0xc0] ss:$16 sps:$4 sm:$0xff]   ;;  %v1478_v17 = vld [vmem:[#allocation3 + $0xe4] ss:$16 sps:$4 sm:$0xff]   ;;  %v1845_v49 = vpack.c.bf16 %v1836_v14, %v1836_v14  ;;  %v1511_v57 = vld [vmem:[#allocation3 + $0x48] ss:$16 sps:$4 sm:$0xff]  }
  0x42   :  { %v1480_v19 = vld [vmem:[#allocation3 + $0xe0] ss:$16 sps:$4 sm:$0xff]   ;;  %v1481_v20 = vld [vmem:[#allocation3 + $0x104] ss:$16 sps:$4 sm:$0xff]   ;;  %v1516_v58 = vld [vmem:[#allocation3 + $0x6c] ss:$16 sps:$4 sm:$0xff]  }
  0x43   :  { %v1840_v18 = vpack.c.bf16 %v85_v15, %v85_v15  ;;  %v1483_v21 = vld [vmem:[#allocation3 + $0x100] ss:$16 sps:$4 sm:$0xff]   ;;  %v1484_v22 = vld [vmem:[#allocation3 + $0x124] ss:$16 sps:$4 sm:$0xff]   ;;  %v1514_v61 = vld [vmem:[#allocation3 + $0x68] ss:$16 sps:$4 sm:$0xff]  }
  0x44   :  { %501 = vmatpush1.bf16.msra.mxu1 %v1465_v6  ;;  %v1486_v23 = vld [vmem:[#allocation3 + $0x120] ss:$16 sps:$4 sm:$0xff]   ;;  %v1487_v24 = vld [vmem:[#allocation3 + $0x144] ss:$16 sps:$4 sm:$0xff]   ;;  %v1519_v62 = vld [vmem:[#allocation3 + $0x8c] ss:$16 sps:$4 sm:$0xff]  }
  0x45   :  { %502 = vmatprep.subr.bf16.mxu1 %v1466_v7  ;;  %528 = vmatprep.mubr.bf16.mxu1 %v1840_v18  ;;  %v1489_v25 = vld [vmem:[#allocation3 + $0x140] ss:$16 sps:$4 sm:$0xff]   ;;  %v1490_v26 = vld [vmem:[#allocation3 + $0x164] ss:$16 sps:$4 sm:$0xff]   ;;  %v1517_v1 = vld [vmem:[#allocation3 + $0x88] ss:$16 sps:$4 sm:$0xff]  }
  0x46   :  { %v1492_v27 = vld [vmem:[#allocation3 + $0x160] ss:$16 sps:$4 sm:$0xff]   ;;  %v1493_v28 = vld [vmem:[#allocation3 + $0x184] ss:$16 sps:$4 sm:$0xff]   ;;  %v1522_v2 = vld [vmem:[#allocation3 + $0xac] ss:$16 sps:$4 sm:$0xff]  }
  0x47   :  { %v1553_v29 = vld [vmem:[#allocation5 + $0x4] ss:$8 sps:$4 sm:$0xff]   ;;  %v1555_v30 = vld [vmem:[#allocation5] ss:$8 sps:$4 sm:$0xff]   ;;  %v1556_v31 = vld [vmem:[#allocation5 + $0x14] ss:$8 sps:$4 sm:$0xff]  }
  0x48   :  { %503 = vmatpush1.bf16.msra.mxu1 %v1468_v8  ;;  %v1495_v32 = vld [vmem:[#allocation3 + $0x180] ss:$16 sps:$4 sm:$0xff]   ;;  %982 = vmatprep.subr.bf16.mxu0 %v1553_v29  ;;  %v1496_v34 = vld [vmem:[#allocation3 + $0x1a4] ss:$16 sps:$4 sm:$0xff]   ;;  %v1520_v5 = vld [vmem:[#allocation3 + $0xa8] ss:$16 sps:$4 sm:$0xff]  }
  0x49   :  { %504 = vmatprep.subr.bf16.mxu1 %v1469_v9  ;;  %983 = vmatpush1.bf16.msra.mxu0 %v1555_v30  ;;  %v1558_v33 = vld [vmem:[#allocation5 + $0x10] ss:$8 sps:$4 sm:$0xff]   ;;  %v1559_v35 = vld [vmem:[#allocation5 + $0x24] ss:$8 sps:$4 sm:$0xff]   ;;  %v1561_v37 = vld [vmem:[#allocation5 + $0x20] ss:$8 sps:$4 sm:$0xff]  }
  0x4a   :  { %984 = vmatprep.subr.bf16.mxu0 %v1556_v31  ;;  %v1498_v36 = vld [vmem:[#allocation3 + $0x1a0] ss:$16 sps:$4 sm:$0xff]   ;;  %v1499_v38 = vld [vmem:[#allocation3 + $0x1c4] ss:$16 sps:$4 sm:$0xff]   ;;  %v1525_v6 = vld [vmem:[#allocation3 + $0xcc] ss:$16 sps:$4 sm:$0xff]  }
  0x4b   :  { %v1562_v39 = vld [vmem:[#allocation5 + $0x34] ss:$8 sps:$4 sm:$0xff]   ;;  %v1501_v40 = vld [vmem:[#allocation3 + $0x1c0] ss:$16 sps:$4 sm:$0xff]   ;;  %v1565_v43 = vld [vmem:[#allocation5 + $0x44] ss:$8 sps:$4 sm:$0xff]  }
  0x4c   :  { %505 = vmatpush1.bf16.msra.mxu1 %v1471_v10  ;;  %v1564_v41 = vld [vmem:[#allocation5 + $0x30] ss:$8 sps:$4 sm:$0xff]   ;;  %v1502_v42 = vld [vmem:[#allocation3 + $0x1e4] ss:$16 sps:$4 sm:$0xff]   ;;  %v1567_v45 = vld [vmem:[#allocation5 + $0x40] ss:$8 sps:$4 sm:$0xff]  }
  0x4d   :  { %506 = vmatprep.subr.bf16.mxu1 %v1472_v11  ;;  %985 = vmatpush1.bf16.msra.mxu0 %v1558_v33  ;;  %v1504_v44 = vld [vmem:[#allocation3 + $0x1e0] ss:$16 sps:$4 sm:$0xff]   ;;  %v1568_v47 = vld [vmem:[#allocation5 + $0x54] ss:$8 sps:$4 sm:$0xff]   ;;  %v1571_v52 = vld [vmem:[#allocation5 + $0x64] ss:$8 sps:$4 sm:$0xff]  }
  0x4e   :  { %986 = vmatprep.subr.bf16.mxu0 %v1559_v35  ;;  %v1570_v51 = vld [vmem:[#allocation5 + $0x50] ss:$8 sps:$4 sm:$0xff]   ;;  %v1573_v55 = vld [vmem:[#allocation5 + $0x60] ss:$8 sps:$4 sm:$0xff]   ;;  %v1574_v56 = vld [vmem:[#allocation5 + $0x74] ss:$8 sps:$4 sm:$0xff]  }
  0x4f   :  { %v1576_v59 = vld [vmem:[#allocation5 + $0x70] ss:$8 sps:$4 sm:$0xff]   ;;  %v1577_v60 = vld [vmem:[#allocation5 + $0x84] ss:$8 sps:$4 sm:$0xff]   ;;  %v1579_v63 = vld [vmem:[#allocation5 + $0x80] ss:$8 sps:$4 sm:$0xff]  }
  0x50   :  { %507 = vmatpush1.bf16.msra.mxu1 %v1474_v12  ;;  %v1580_v0 = vld [vmem:[#allocation5 + $0x94] ss:$8 sps:$4 sm:$0xff]   ;;  %v1582_v3 = vld [vmem:[#allocation5 + $0x90] ss:$8 sps:$4 sm:$0xff]   ;;  %v1583_v4 = vld [vmem:[#allocation5 + $0xa4] ss:$8 sps:$4 sm:$0xff]  }
  0x51   :  { %508 = vmatprep.subr.bf16.mxu1 %v1475_v13  ;;  %987 = vmatpush1.bf16.msra.mxu0 %v1561_v37  ;;  %v1585_v7 = vld [vmem:[#allocation5 + $0xa0] ss:$8 sps:$4 sm:$0xff]   ;;  %v1586_v8 = vld [vmem:[#allocation5 + $0xb4] ss:$8 sps:$4 sm:$0xff]   ;;  %v1588_v11 = vld [vmem:[#allocation5 + $0xb0] ss:$8 sps:$4 sm:$0xff]  }
  0x52   :  { %988 = vmatprep.subr.bf16.mxu0 %v1562_v39  ;;  %v1523_v9 = vld [vmem:[#allocation3 + $0xc8] ss:$16 sps:$4 sm:$0xff]   ;;  %v1528_v10 = vld [vmem:[#allocation3 + $0xec] ss:$16 sps:$4 sm:$0xff]   ;;  %v1650_v39 = vld [vmem:[#allocation7] sm:$0xff]   ;;  %vm1252_vm0 = vcmask 1041408  }
  0x53   :  { %v1589_v12 = vld [vmem:[#allocation5 + $0xc4] ss:$8 sps:$4 sm:$0xff]   ;;  %v1526_v13 = vld [vmem:[#allocation3 + $0xe8] ss:$16 sps:$4 sm:$0xff]   ;;  %v1598_v35 = vld [vmem:[#allocation5 + $0xf4] ss:$8 sps:$4 sm:$0xff]  }
  0x54   :  { %509 = vmatpush1.bf16.msra.mxu1 %v1477_v16  ;;  %v1531_v14 = vld [vmem:[#allocation3 + $0x10c] ss:$16 sps:$4 sm:$0xff]   ;;  %v1591_v15 = vld [vmem:[#allocation5 + $0xc0] ss:$8 sps:$4 sm:$0xff]   ;;  %vm1264_vm1 = vcmask 1024  }
  0x55   :  { %510 = vmatprep.subr.bf16.mxu1 %v1478_v17  ;;  %989 = vmatpush1.bf16.msra.mxu0 %v1564_v41  ;;  %v1592_v16 = vld [vmem:[#allocation5 + $0xd4] ss:$8 sps:$4 sm:$0xff]   ;;  %v1529_v17 = vld [vmem:[#allocation3 + $0x108] ss:$16 sps:$4 sm:$0xff]   ;;  %v1595_v33 = vld [vmem:[#allocation5 + $0xe4] ss:$8 sps:$4 sm:$0xff]  }
  0x56   :  { %990 = vmatprep.subr.bf16.mxu0 %v1565_v43  ;;  %v1549_v29 = vld [vmem:[#allocation3 + $0x1cc] ss:$16 sps:$4 sm:$0xff]   ;;  %v1547_v30 = vld [vmem:[#allocation3 + $0x1c8] ss:$16 sps:$4 sm:$0xff]   ;;  %v1654_v43 = vld [vmem:[#allocation7 + $0x10] sm:$0xff]  }
  0x57   :  { %v1552_v31 = vld [vmem:[#allocation3 + $0x1ec] ss:$16 sps:$4 sm:$0xff]  }
  0x58   :  { %511 = vmatpush1.bf16.msra.mxu1 %v1480_v19  ;;  %v1594_v19 = vld [vmem:[#allocation5 + $0xd0] ss:$8 sps:$4 sm:$0xff]   ;;  %v1603_v37 = vld [vmem:[#allocation5 + $0x104] ss:$8 sps:$4 sm:$0xff]  }
  0x59   :  { %512 = vmatprep.subr.bf16.mxu1 %v1481_v20  ;;  %991 = vmatpush1.bf16.msra.mxu0 %v1567_v45  ;;  %v1532_v20 = vld [vmem:[#allocation3 + $0x128] ss:$16 sps:$4 sm:$0xff]  }
  0x5a   :  { %992 = vmatprep.subr.bf16.mxu0 %v1568_v47  ;;  %v1652_v41 = vld [vmem:[#allocation7 + $0x8] sm:$0xff]   ;;  %v1656_v45 = vld [vmem:[#allocation7 + $0x18] sm:$0xff]   ;;  %v1658_v47 = vld [vmem:[#allocation7 + $0x20] sm:$0xff]  }
  0x5c   :  { %513 = vmatpush1.bf16.msra.mxu1 %v1483_v21  ;;  %v1537_v21 = vld [vmem:[#allocation3 + $0x14c] ss:$16 sps:$4 sm:$0xff]  }
  0x5d   :  { %514 = vmatprep.subr.bf16.mxu1 %v1484_v22  ;;  %993 = vmatpush1.bf16.msra.mxu0 %v1570_v51  ;;  %v1535_v22 = vld [vmem:[#allocation3 + $0x148] ss:$16 sps:$4 sm:$0xff]  }
  0x5e   :  { %994 = vmatprep.subr.bf16.mxu0 %v1571_v52 }
  0x60   :  { %515 = vmatpush1.bf16.msra.mxu1 %v1486_v23  ;;  %v1540_v23 = vld [vmem:[#allocation3 + $0x16c] ss:$16 sps:$4 sm:$0xff]  }
  0x61   :  { %516 = vmatprep.subr.bf16.mxu1 %v1487_v24  ;;  %995 = vmatpush1.bf16.msra.mxu0 %v1573_v55  ;;  %v1538_v24 = vld [vmem:[#allocation3 + $0x168] ss:$16 sps:$4 sm:$0xff]  }
  0x62   :  { %996 = vmatprep.subr.bf16.mxu0 %v1574_v56 }
  0x64   :  { %517 = vmatpush1.bf16.msra.mxu1 %v1489_v25  ;;  %v1543_v25 = vld [vmem:[#allocation3 + $0x18c] ss:$16 sps:$4 sm:$0xff]  }
  0x65   :  { %518 = vmatprep.subr.bf16.mxu1 %v1490_v26  ;;  %997 = vmatpush1.bf16.msra.mxu0 %v1576_v59  ;;  %v1541_v26 = vld [vmem:[#allocation3 + $0x188] ss:$16 sps:$4 sm:$0xff]  }
  0x66   :  { %998 = vmatprep.subr.bf16.mxu0 %v1577_v60 }
  0x68   :  { %519 = vmatpush1.bf16.msra.mxu1 %v1492_v27  ;;  %v1546_v27 = vld [vmem:[#allocation3 + $0x1ac] ss:$16 sps:$4 sm:$0xff]  }
  0x69   :  { %520 = vmatprep.subr.bf16.mxu1 %v1493_v28  ;;  %999 = vmatpush1.bf16.msra.mxu0 %v1579_v63  ;;  %v1544_v28 = vld [vmem:[#allocation3 + $0x1a8] ss:$16 sps:$4 sm:$0xff]  }
  0x6a   :  { %1000 = vmatprep.subr.bf16.mxu0 %v1580_v0 }
  0x6c   :  { %521 = vmatpush1.bf16.msra.mxu1 %v1495_v32  ;;  %v1550_v32 = vld [vmem:[#allocation3 + $0x1e8] ss:$16 sps:$4 sm:$0xff]  }
  0x6d   :  { %522 = vmatprep.subr.bf16.mxu1 %v1496_v34  ;;  %1001 = vmatpush1.bf16.msra.mxu0 %v1582_v3  ;;  %v1597_v34 = vld [vmem:[#allocation5 + $0xe0] ss:$8 sps:$4 sm:$0xff]  }
  0x6e   :  { %1002 = vmatprep.subr.bf16.mxu0 %v1583_v4  ;;  %v1601_v3 = vld [vmem:[#allocation5 + $0x100] ss:$8 sps:$4 sm:$0xff]   ;;  %v1606_v4 = vld [vmem:[#allocation5 + $0x114] ss:$8 sps:$4 sm:$0xff]  }
  0x70   :  { %523 = vmatpush1.bf16.msra.mxu1 %v1498_v36  ;;  %v1600_v36 = vld [vmem:[#allocation5 + $0xf0] ss:$8 sps:$4 sm:$0xff]  }
  0x71   :  { %524 = vmatprep.subr.bf16.mxu1 %v1499_v38  ;;  %1003 = vmatpush1.bf16.msra.mxu0 %v1585_v7  ;;  %v1649_v38 = vld [vmem:[#allocation7 + $0x40] sm:$0xff]  }
  0x72   :  { %1004 = vmatprep.subr.bf16.mxu0 %v1586_v8  ;;  %v1607_v7 = vld [vmem:[#allocation5 + $0x120] ss:$8 sps:$4 sm:$0xff]   ;;  %v1612_v8 = vld [vmem:[#allocation5 + $0x134] ss:$8 sps:$4 sm:$0xff]  }
  0x74   :  { %525 = vmatpush1.bf16.msra.mxu1 %v1501_v40  ;;  %v1651_v40 = vld [vmem:[#allocation7 + $0x48] sm:$0xff]  }
  0x75   :  { %526 = vmatprep.subr.bf16.mxu1 %v1502_v42  ;;  %1005 = vmatpush1.bf16.msra.mxu0 %v1588_v11  ;;  %v1653_v42 = vld [vmem:[#allocation7 + $0x50] sm:$0xff]   ;;  %v1613_v11 = vld [vmem:[#allocation5 + $0x140] ss:$8 sps:$4 sm:$0xff]  }
  0x76   :  { %1006 = vmatprep.subr.bf16.mxu0 %v1589_v12  ;;  %v1618_v12 = vld [vmem:[#allocation5 + $0x154] ss:$8 sps:$4 sm:$0xff]  }
  0x78   :  { %527 = vmatpush1.bf16.msra.mxu1 %v1504_v44  ;;  %v1655_v44 = vld [vmem:[#allocation7 + $0x58] sm:$0xff]  }
  0x79   :  { %537 = vmatprep.subr.bf16.mxu1 %v1507_v46  ;;  %1007 = vmatpush1.bf16.msra.mxu0 %v1591_v15  ;;  %v1657_v46 = vld [vmem:[#allocation7 + $0x60] sm:$0xff]  }
  0x7a   :  { %1008 = vmatprep.subr.bf16.mxu0 %v1592_v16  ;;  %v1619_v15 = vld [vmem:[#allocation5 + $0x160] ss:$8 sps:$4 sm:$0xff]   ;;  %v1624_v16 = vld [vmem:[#allocation5 + $0x174] ss:$8 sps:$4 sm:$0xff]  }
  0x7b   :  { %529 = vmatmul.mubr.bf16.vlgmr.msra.gmra.mrb[0].mxu1 %v1845_v49 }
  0x7c   :  { %538 = vmatpush1.bf16.msra.mxu1 %v1505_v48  ;;  %569 = vmatprep.mubr.bf16.mxu1 %v1840_v18  ;;  %v1534_v18 = vld [vmem:[#allocation3 + $0x12c] ss:$16 sps:$4 sm:$0xff]  }
  0x7d   :  { %539 = vmatprep.subr.bf16.mxu1 %v1510_v50  ;;  %1009 = vmatpush1.bf16.msra.mxu0 %v1594_v19  ;;  %v1659_v48 = vld [vmem:[#allocation7 + $0x68] sm:$0xff]   ;;  %v156_v50 = vlaneseq }
  0x7e   :  { %1010 = vmatprep.subr.bf16.mxu0 %v1595_v33  ;;  %v1625_v19 = vld [vmem:[#allocation5 + $0x180] ss:$8 sps:$4 sm:$0xff]  }
  0x7f   :  { %v1850_v51 = vshrl.u32 %v156_v50, 7  ;;  %v1663_v50 = vld [vmem:[#allocation7 + $0x78] sm:$0xff]  }
  0x80   :  { %540 = vmatpush1.bf16.msra.mxu1 %v1508_v53  ;;  %v1856_v53 = vld [vmem:[%s1887_s2] sm:$0xf] }
  0x81   :  { %541 = vmatprep.subr.bf16.mxu1 %v1513_v54  ;;  %1011 = vmatpush1.bf16.msra.mxu0 %v1597_v34  ;;  %v158_v52 = vsub.s32 0, %v1850_v51  ;;  %v162_v54 = vsub.s32 1, %v1850_v51 }
  0x82   :  { %1012 = vmatprep.subr.bf16.mxu0 %v1598_v35  ;;  %v1643_v35 = vld [vmem:[#allocation5 + $0x1e0] ss:$8 sps:$4 sm:$0xff]  }
  0x83   :  { %v159_v55 = vrot.slane %v1856_v53, %v158_v52  ;;  %v163_v56 = vrot.slane %v1856_v53, %v162_v54 }
  0x84   :  { %542 = vmatpush1.bf16.msra.mxu1 %v1511_v57 }
  0x85   :  { %543 = vmatprep.subr.bf16.mxu1 %v1516_v58  ;;  %1013 = vmatpush1.bf16.msra.mxu0 %v1600_v36  ;;  %v1648_v36 = vld [vmem:[#allocation5 + $0x1f4] ss:$8 sps:$4 sm:$0xff]  }
  0x86   :  { %1023 = vmatprep.subr.bf16.mxu0 %v1603_v37 }
  0x88   :  { %544 = vmatpush1.bf16.msra.mxu1 %v1514_v61 }
  0x89   :  { %545 = vmatprep.subr.bf16.mxu1 %v1519_v62 }
  0x8c   :  { %546 = vmatpush1.bf16.msra.mxu1 %v1517_v1 }
  0x8d   :  { %547 = vmatprep.subr.bf16.mxu1 %v1522_v2 }
  0x90   :  { %548 = vmatpush1.bf16.msra.mxu1 %v1520_v5  ;;  %v1604_v5 = vld [vmem:[#allocation5 + $0x110] ss:$8 sps:$4 sm:$0xff]  }
  0x91   :  { %549 = vmatprep.subr.bf16.mxu1 %v1525_v6  ;;  %v1609_v6 = vld [vmem:[#allocation5 + $0x124] ss:$8 sps:$4 sm:$0xff]  }
  0x94   :  { %550 = vmatpush1.bf16.msra.mxu1 %v1523_v9  ;;  %v1610_v9 = vld [vmem:[#allocation5 + $0x130] ss:$8 sps:$4 sm:$0xff]  }
  0x95   :  { %551 = vmatprep.subr.bf16.mxu1 %v1528_v10  ;;  %v1615_v10 = vld [vmem:[#allocation5 + $0x144] ss:$8 sps:$4 sm:$0xff]  }
  0x98   :  { %552 = vmatpush1.bf16.msra.mxu1 %v1526_v13  ;;  %v1616_v13 = vld [vmem:[#allocation5 + $0x150] ss:$8 sps:$4 sm:$0xff]  }
  0x99   :  { %553 = vmatprep.subr.bf16.mxu1 %v1531_v14  ;;  %v1621_v14 = vld [vmem:[#allocation5 + $0x164] ss:$8 sps:$4 sm:$0xff]  }
  0x9c   :  { %554 = vmatpush1.bf16.msra.mxu1 %v1529_v17  ;;  %v1622_v17 = vld [vmem:[#allocation5 + $0x170] ss:$8 sps:$4 sm:$0xff]  }
  0x9d   :  { %555 = vmatprep.subr.bf16.mxu1 %v1534_v18  ;;  %v1627_v18 = vld [vmem:[#allocation5 + $0x184] ss:$8 sps:$4 sm:$0xff]  }
  0xa0   :  { %556 = vmatpush1.bf16.msra.mxu1 %v1532_v20  ;;  %v1630_v20 = vld [vmem:[#allocation5 + $0x194] ss:$8 sps:$4 sm:$0xff]  }
  0xa1   :  { %557 = vmatprep.subr.bf16.mxu1 %v1537_v21  ;;  %v1628_v21 = vld [vmem:[#allocation5 + $0x190] ss:$8 sps:$4 sm:$0xff]  }
  0xa4   :  { %558 = vmatpush1.bf16.msra.mxu1 %v1535_v22  ;;  %v1633_v22 = vld [vmem:[#allocation5 + $0x1a4] ss:$8 sps:$4 sm:$0xff]  }
  0xa5   :  { %559 = vmatprep.subr.bf16.mxu1 %v1540_v23  ;;  %v1631_v23 = vld [vmem:[#allocation5 + $0x1a0] ss:$8 sps:$4 sm:$0xff]  }
  0xa8   :  { %560 = vmatpush1.bf16.msra.mxu1 %v1538_v24  ;;  %v1636_v24 = vld [vmem:[#allocation5 + $0x1b4] ss:$8 sps:$4 sm:$0xff]  }
  0xa9   :  { %561 = vmatprep.subr.bf16.mxu1 %v1543_v25  ;;  %v1634_v25 = vld [vmem:[#allocation5 + $0x1b0] ss:$8 sps:$4 sm:$0xff]  }
  0xac   :  { %562 = vmatpush1.bf16.msra.mxu1 %v1541_v26  ;;  %v1639_v26 = vld [vmem:[#allocation5 + $0x1c4] ss:$8 sps:$4 sm:$0xff]  }
  0xad   :  { %563 = vmatprep.subr.bf16.mxu1 %v1546_v27  ;;  %v1637_v27 = vld [vmem:[#allocation5 + $0x1c0] ss:$8 sps:$4 sm:$0xff]  }
  0xb0   :  { %564 = vmatpush1.bf16.msra.mxu1 %v1544_v28  ;;  %v1642_v28 = vld [vmem:[#allocation5 + $0x1d4] ss:$8 sps:$4 sm:$0xff]  }
  0xb1   :  { %565 = vmatprep.subr.bf16.mxu1 %v1549_v29  ;;  %v166_v29 = vsub.s32 2, %v1850_v51 }
  0xb3   :  { %v167_v33 = vrot.slane %v1856_v53, %v166_v29 }
  0xb4   :  { %566 = vmatpush1.bf16.msra.mxu1 %v1547_v30  ;;  %v1640_v30 = vld [vmem:[#allocation5 + $0x1d0] ss:$8 sps:$4 sm:$0xff]  }
  0xb5   :  { %567 = vmatprep.subr.bf16.mxu1 %v1552_v31  ;;  %v170_v31 = vsub.s32 3, %v1850_v51 }
  0xb7   :  { %v171_v34 = vrot.slane %v1856_v53, %v170_v31  ;;  %v1664_v53 = vld [vmem:[#allocation7 + $0x38] sm:$0xff]  }
  0xb8   :  { %568 = vmatpush1.bf16.msra.mxu1 %v1550_v32  ;;  %v1645_v32 = vld [vmem:[#allocation5 + $0x1e4] ss:$8 sps:$4 sm:$0xff]  }
  0xb9   :  { %1420 = vmatprep.subr.bf16.mxu1 %v1649_v38 }
  0xbb   :  { %570 = vmatmul.mubr.bf16.vlgmr.msra.gmra.mrb[4].mxu1 %v1845_v49  ;;  %v1660_v49 = vld [vmem:[#allocation7 + $0x28] sm:$0xff]  }
  0xbc   :  { %1421 = vmatpush3.bf16.msra.mxu1 %v1650_v39 }
  0xbd   :  { %1422 = vmatprep.subr.bf16.mxu1 %v1651_v40 }
  0xc0   :  { %1423 = vmatpush3.bf16.msra.mxu1 %v1652_v41 }
  0xc1   :  { %1424 = vmatprep.subr.bf16.mxu1 %v1653_v42  ;;  %v1646_v42 = vld [vmem:[#allocation5 + $0x1f0] ss:$8 sps:$4 sm:$0xff]  }
  0xc4   :  { %1425 = vmatpush3.bf16.msra.mxu1 %v1654_v43 }
  0xc5   :  { %1426 = vmatprep.subr.bf16.mxu1 %v1655_v44 }
  0xc8   :  { %1427 = vmatpush3.bf16.msra.mxu1 %v1656_v45 }
  0xc9   :  { %1428 = vmatprep.subr.bf16.mxu1 %v1657_v46 }
  0xcc   :  { %1429 = vmatpush3.bf16.msra.mxu1 %v1658_v47 }
  0xcd   :  { %1430 = vmatprep.subr.bf16.mxu1 %v1659_v48  ;;  %v1661_v48 = vld [vmem:[#allocation7 + $0x70] sm:$0xff]  }
  0xd0   :  { %1431 = vmatpush3.bf16.msra.mxu1 %v1660_v49  ;;  %v1662_v49 = vld [vmem:[#allocation7 + $0x30] sm:$0xff]  }
  0xd1   :  { %1432 = vmatprep.subr.bf16.mxu1 %v1661_v48 }
  0xd4   :  { %1433 = vmatpush3.bf16.msra.mxu1 %v1662_v49 }
  0xd5   :  { %1434 = vmatprep.subr.bf16.mxu1 %v1663_v50 }
  0xd8   :  { %1435 = vmatpush3.bf16.msra.mxu1 %v1664_v53 }
 0x14e   :  { %v530_v57 = vpop.f32.mrb[0].mxu1 }
 0x14f   :  { %v531_v58 = vadd.f32 %v530_v57, %v159_v55  ;;  %v532_v59 = vpop.f32.mrb[1].mxu1  ;;  %v650_v55 = vld [vmem:[%s1889_s4] sm:$0x3] }
 0x150   :  { %v533_v60 = vadd.f32 %v532_v59, %v163_v56  ;;  %v534_v61 = vpop.f32.mrb[2].mxu1  ;;  %v655_v56 = vrot.slane %v650_v55, %v158_v52  ;;  %v659_v57 = vrot.slane %v650_v55, %v162_v54  ;;  %v1401_v52 = vld [vmem:[%s1891_s6] ss:$0 sm:$0xff] }
 0x151   :  { %v578_v62 = vmax.f32 %v531_v58, 0.0  ;;  %v535_v63 = vpop.f32.mrb[3].mxu1 }
 0x152   :  { %v579_v0 = vmax.f32 %v533_v60, 0.0 }
 0x153   :  { %v582_v1 = vpack.c.bf16 %v578_v62, %v578_v62 }
 0x154   :  { %v583_v2 = vpack.c.bf16 %v579_v0, %v579_v0 }
 0x156   :  { %1014 = vmatprep.mubr.bf16.mxu0 %v583_v2 }
 0x157   :  { %1015 = vmatmul.mubr.bf16.vlgmr.msra.gmra.mrb[0].mxu0 %v582_v1 }
 0x158   :  { %1024 = vmatpush1.bf16.msra.mxu0 %v1601_v3 }
 0x159   :  { %1025 = vmatprep.subr.bf16.mxu0 %v1606_v4 }
 0x15c   :  { %1026 = vmatpush1.bf16.msra.mxu0 %v1604_v5 }
 0x15d   :  { %1027 = vmatprep.subr.bf16.mxu0 %v1609_v6 }
 0x160   :  { %1028 = vmatpush1.bf16.msra.mxu0 %v1607_v7 }
 0x161   :  { %1029 = vmatprep.subr.bf16.mxu0 %v1612_v8  ;;  %v1418_v8 = vld [vmem:[%s1892_s7] ss:$0 sm:$0xff] }
 0x164   :  { %1030 = vmatpush1.bf16.msra.mxu0 %v1610_v9 }
 0x165   :  { %1031 = vmatprep.subr.bf16.mxu0 %v1615_v10 }
 0x168   :  { %1032 = vmatpush1.bf16.msra.mxu0 %v1613_v11 }
 0x169   :  { %1033 = vmatprep.subr.bf16.mxu0 %v1618_v12  ;;  %v1419_v12 = vld [vmem:[#allocation2] ss:$0 sm:$0xff] }
 0x16c   :  { %1034 = vmatpush1.bf16.msra.mxu0 %v1616_v13 }
 0x16d   :  { %1035 = vmatprep.subr.bf16.mxu0 %v1621_v14 }
 0x170   :  { %1036 = vmatpush1.bf16.msra.mxu0 %v1619_v15 }
 0x171   :  { %1037 = vmatprep.subr.bf16.mxu0 %v1624_v16 }
 0x174   :  { %1038 = vmatpush1.bf16.msra.mxu0 %v1622_v17 }
 0x175   :  { %1039 = vmatprep.subr.bf16.mxu0 %v1627_v18 }
 0x178   :  { %1040 = vmatpush1.bf16.msra.mxu0 %v1625_v19 }
 0x179   :  { %1041 = vmatprep.subr.bf16.mxu0 %v1630_v20 }
 0x17c   :  { %1042 = vmatpush1.bf16.msra.mxu0 %v1628_v21 }
 0x17d   :  { %1043 = vmatprep.subr.bf16.mxu0 %v1633_v22 }
 0x180   :  { %1044 = vmatpush1.bf16.msra.mxu0 %v1631_v23 }
 0x181   :  { %1045 = vmatprep.subr.bf16.mxu0 %v1636_v24 }
 0x184   :  { %1046 = vmatpush1.bf16.msra.mxu0 %v1634_v25 }
 0x185   :  { %1047 = vmatprep.subr.bf16.mxu0 %v1639_v26 }
 0x188   :  { %1048 = vmatpush1.bf16.msra.mxu0 %v1637_v27 }
 0x189   :  { %1049 = vmatprep.subr.bf16.mxu0 %v1642_v28 }
 0x18c   :  { %1050 = vmatpush1.bf16.msra.mxu0 %v1640_v30 }
 0x18d   :  { %1051 = vmatprep.subr.bf16.mxu0 %v1645_v32 }
 0x18e   :  { %v571_v37 = vpop.f32.mrb[4].mxu1 }
 0x18f   :  { %v572_v38 = vadd.f32 %v571_v37, %v167_v33  ;;  %v573_v39 = vpop.f32.mrb[5].mxu1 }
 0x190   :  { %v574_v40 = vadd.f32 %v573_v39, %v171_v34  ;;  %v575_v41 = vpop.f32.mrb[6].mxu1  ;;  %1052 = vmatpush1.bf16.msra.mxu0 %v1643_v35 }
 0x191   :  { %v580_v43 = vmax.f32 %v572_v38, 0.0  ;;  %v576_v44 = vpop.f32.mrb[7].mxu1  ;;  %1053 = vmatprep.subr.bf16.mxu0 %v1648_v36 }
 0x192   :  { %v581_v45 = vmax.f32 %v574_v40, 0.0 }
 0x193   :  { %v584_v47 = vpack.c.bf16 %v580_v43, %v580_v43 }
 0x194   :  { %v585_v46 = vpack.c.bf16 %v581_v45, %v581_v45  ;;  %1054 = vmatpush1.bf16.msra.mxu0 %v1646_v42 }
 0x196   :  { %1055 = vmatprep.mubr.bf16.mxu0 %v585_v46 }
 0x197   :  { %1056 = vmatmul.mubr.bf16.vlgmr.msra.gmra.mrb[0].mxu0 %v584_v47 }
 0x26a   :  { %v1057_v58 = vpop.f32.mrb[0].mxu0 }
 0x26b   :  { %v1442_v59 = vadd.f32 %v1057_v58, %v655_v56  ;;  %v1059_v60 = vpop.f32.mrb[1].mxu0 }
 0x26c   :  { %v1443_v61 = vadd.f32 %v1059_v60, %v659_v57  ;;  %v1061_v62 = vpop.f32.mrb[2].mxu0 }
 0x26d   :  { %v1064_v63 = vmax.f32 %v1442_v59, 0.0  ;;  %v1062_v0 = vpop.f32.mrb[3].mxu0 }
 0x26e   :  { %v1065_v1 = vmax.f32 %v1443_v61, 0.0 }
 0x26f   :  { %v1066_v3 = vpack.c.bf16 %v1064_v63, %v1064_v63 }
 0x270   :  { %v1067_v2 = vpack.c.bf16 %v1065_v1, %v1065_v1 }
 0x272   :  { %1235 = vmatprep.mubr.bf16.mxu1 %v1067_v2 }
 0x273   :  { %1236 = vmatmul.mubr.bf16.vlgmr.msra.gmra.mrb[8].mxu1 %v1066_v3 }
 0x346   :  { %v1436_v4 = vpop.f32.mrb[8].mxu1 }
 0x347   :  { %v1437_v5 = vpop.f32.mrb[9].mxu1 }
 0x348   :  { %v1438_v51 = vadd.f32 %v1437_v5, %v1436_v4  ;;  %v1439_v54 = vpop.f32.mrb[10].mxu1 }
 0x349   :  { %v1440_v6 = vpop.f32.mrb[11].mxu1 }
 0x34a   :  { %v1238_v7 = vadd.f32 %v1438_v51, %v1401_v52 }
 0x34c   :  { %v1243_v9 = vmax.f32 %v1238_v7, 0.0 }
 0x34e   :  { %v1251_v10 = vmul.f32 %v1418_v8, %v1243_v9 }
 0x350   :  { %v1253_v11 = vsel %vm1252_vm0, %v1251_v10, 0.0 }
 0x351   :  { %1254 = vadd.xlane.f32.xlu0 %v1253_v11 }
 0x3de   :  { %v1255_v13 = vpop.xlane.xlu0 %1254 }
 0x3df   :  { %v1263_v14 = vadd.f32 %v1419_v12, %v1255_v13 }
 0x3e1   :  { %1265 = vst.msk [vmem:[%s1894_s9] sm:$0x3] %vm1264_vm1, %v1263_v14 }
 0x3e2   :  { %1270 = vsyncpa [#allocation4], 1 }
 0x3e3   :  { %1271 = vsyncpa [#allocation6], 1 }

</bundles_post_ra>
